<compile_context>
chip_gen: v5e
topology: v5e:2x2
jax: 0.10.0
libtpu: 0.0.40
codegen_flags: <defaults>
</compile_context>

<pallas_src>
import jax
import jax.numpy as jnp
from jax.experimental import pallas as pl
from jax.experimental.pallas import tpu as pltpu

IN_FEATURES = 128
MAX_TILE_M = 4096  # rows per tile (multiple of 128); 2 MiB f32 input tile


def _linear_kernel(x_ref, w_ref, b_ref, o_ref):
    # x_ref: (tm, 128) VMEM   w_ref: (1, 128) VMEM   b_ref: (1,) SMEM
    # o_ref: (1, tm)  VMEM   (lane-dense)
    # (1,128) x (tm,128) contracted over the feature dim -> (1, tm) on the MXU
    # (the q @ k^T "NT" pattern); f32 accumulation.
    acc = jax.lax.dot_general(
        w_ref[...], x_ref[...],
        dimension_numbers=(((1,), (1,)), ((), ())),
        preferred_element_type=jnp.float32,
    )
    o_ref[...] = (acc + b_ref[0]).astype(o_ref.dtype)


def netD_D_forward(x, weight, bias, *, cast_to_bf16=False, max_tile_m=MAX_TILE_M):
    """x: any f32 array whose total size is divisible by 128.
    weight: (1, 128) (PyTorch nn.Linear layout), bias: (1,).
    Returns (M, 1, 1, 1) with M = x.size // 128."""
    x2d = x.reshape(-1, IN_FEATURES)            # same semantics as torch .view(-1, 128)
    m = x2d.shape[0]

    if cast_to_bf16:
        x2d = x2d.astype(jnp.bfloat16)          # opt-in: halves HBM read traffic

    w = weight.reshape(1, IN_FEATURES).astype(x2d.dtype)   # (1, 128), resident
    b = bias.reshape(1).astype(jnp.float32)                # scalar in SMEM

    # Single tile for small m (block == full array dims is always legal);
    # otherwise a 128-multiple tile so partial final blocks satisfy (8, 128).
    tm = m if m <= max_tile_m else max_tile_m
    grid_m = pl.cdiv(m, tm)
    assert grid_m == 1 or tm % 128 == 0, "multi-tile path needs tm % 128 == 0"

    in_bytes = x2d.size * x2d.dtype.itemsize
    cost = pl.CostEstimate(
        flops=2 * m * IN_FEATURES,
        transcendentals=0,
        bytes_accessed=in_bytes + m * 4 + IN_FEATURES * 4 + 4,
    )

    out = pl.pallas_call(
        _linear_kernel,
        out_shape=jax.ShapeDtypeStruct((1, m), jnp.float32),
        grid_spec=pl.GridSpec(
            grid=(grid_m,),
            in_specs=[
                # Input tiles stream through VMEM, double-buffered by Pallas.
                pl.BlockSpec((tm, IN_FEATURES), lambda i: (i, 0)),
                # Weight: constant index_map -> loaded once, resident across tiles.
                pl.BlockSpec((1, IN_FEATURES), lambda i: (0, 0)),
                # Bias: single scalar in SMEM.
                pl.BlockSpec(memory_space=pltpu.MemorySpace.SMEM),
            ],
            # Lane-dense output row; OOB lanes of a partial final block are
            # discarded on writeback.
            out_specs=pl.BlockSpec((1, tm), lambda i: (0, i)),
        ),
        compiler_params=pltpu.CompilerParams(
            dimension_semantics=("parallel",),      # shards tiles across TCs on v7x
            vmem_limit_bytes=32 * 1024 * 1024,      # headroom; below physical on all chips
        ),
        cost_estimate=cost,
    )(x2d, w, b)

    return out.reshape(-1, 1, 1, 1)


if __name__ == "__main__":
    key = jax.random.PRNGKey(0)
    kx, kw, kb, kx2 = jax.random.split(key, 4)

    # Deterministic synthetic parameters (nn.Linear(128, 1) shapes).
    weight = jax.random.normal(kw, (1, IN_FEATURES), dtype=jnp.float32) * 0.05
    bias = jax.random.normal(kb, (1,), dtype=jnp.float32) * 0.05

    # Test 1: input consistent with the module (anything reshapable to (-1, 128)).
    # batch=2, channels=4, spatial=16x16 -> 2*4*16*16 / 128 = 16 rows.
    x = jax.random.normal(kx, (2, 4, 16, 16), dtype=jnp.float32)
    y = netD_D_forward(x, weight, bias)
    jax.block_until_ready(y)
    ref = (x.reshape(-1, 128) @ weight.T + bias).reshape(-1, 1, 1, 1)
    assert y.shape == (16, 1, 1, 1), y.shape
    assert jnp.allclose(y, ref, atol=1e-5), "mismatch vs reference (single-tile)"

    # Test 2: exercise the multi-tile path with a partial final block
    # (m=300, tile=128 -> grid of 3, last block 44 valid rows).
    x2 = jax.random.normal(kx2, (300, IN_FEATURES), dtype=jnp.float32)
    y2 = netD_D_forward(x2, weight, bias, max_tile_m=128)
    jax.block_until_ready(y2)
    ref2 = (x2 @ weight.T + bias).reshape(-1, 1, 1, 1)
    assert y2.shape == (300, 1, 1, 1), y2.shape
    assert jnp.allclose(y2, ref2, atol=1e-5), "mismatch vs reference (multi-tile)"

    print("KERNEL_OK")
</pallas_src>

<mosaic_0001>
module attributes {stable_mosaic.version = 11 : i64} {
  func.func @_linear_kernel(%arg0: i32, %arg1: memref<16x128xf32, #tpu.memory_space<vmem>>, %arg2: memref<1x128xf32, #tpu.memory_space<vmem>>, %arg3: memref<1xf32, #tpu.memory_space<smem>>, %arg4: memref<1x16xf32, #tpu.memory_space<vmem>>) attributes {dimension_semantics = [#tpu.dimension_semantics<parallel>], iteration_bounds = array<i64: 1>, scalar_prefetch = 0 : i64, scratch_operands = 0 : i64, tpu.core_type = #tpu.core_type<tc>, window_params = [{transform_indices = @transform_0, window_bounds = array<i64: 16, 128>}, {pipeline_mode = #tpu.pipeline_mode<synchronous>, transform_indices = @transform_1, window_bounds = array<i64: 1, 128>}, {transform_indices = @transform_2, window_bounds = array<i64: 1>}, {transform_indices = @transform_3, window_bounds = array<i64: 1, 16>}]} {
    %c0 = arith.constant 0 : index
    %c0_0 = arith.constant 0 : index
    %0 = vector.load %arg2[%c0, %c0_0] : memref<1x128xf32, #tpu.memory_space<vmem>>, vector<1x128xf32>
    %c0_1 = arith.constant 0 : index
    %c0_2 = arith.constant 0 : index
    %1 = vector.load %arg1[%c0_1, %c0_2] : memref<16x128xf32, #tpu.memory_space<vmem>>, vector<16x128xf32>
    %cst = arith.constant dense<0.000000e+00> : vector<1x16xf32>
    %2 = tpu.matmul %0, %1, %cst {dimension_numbers = #tpu.dot_dimension_numbers<[1], [1], [0], [0], [0, 0, 1, 0], [], []>} : vector<1x128xf32>, vector<16x128xf32>, vector<1x16xf32> -> vector<1x16xf32>
    %c0_3 = arith.constant 0 : index
    %3 = memref.load %arg3[%c0_3] : memref<1xf32, #tpu.memory_space<smem>>
    %4 = vector.broadcast %3 : f32 to vector<1x16xf32>
    %5 = arith.addf %2, %4 : vector<1x16xf32>
    %c0_4 = arith.constant 0 : index
    %c0_5 = arith.constant 0 : index
    %6 = vector.load %arg4[%c0_4, %c0_5] : memref<1x16xf32, #tpu.memory_space<vmem>>, vector<1x16xf32>
    tpu.vector_store %arg4[%c0_4, %c0_5], %5 {strides = array<i32>} : memref<1x16xf32, #tpu.memory_space<vmem>>, vector<1x16xf32>,
    return
  }
  func.func @transform_0(%arg0: i32) -> (i32, i32) {
    %c0_i32 = arith.constant 0 : i32
    %c0_i32_0 = arith.constant 0 : i32
    return %arg0, %c0_i32 : i32, i32
  }
  func.func @transform_1(%arg0: i32) -> (i32, i32) {
    %c0_i32 = arith.constant 0 : i32
    %c0_i32_0 = arith.constant 0 : i32
    %c0_i32_1 = arith.constant 0 : i32
    return %c0_i32, %c0_i32_0 : i32, i32
  }
  func.func @transform_2(%arg0: i32) -> i32 {
    %c0_i32 = arith.constant 0 : i32
    %c0_i32_0 = arith.constant 0 : i32
    return %c0_i32 : i32
  }
  func.func @transform_3(%arg0: i32) -> (i32, i32) {
    %c0_i32 = arith.constant 0 : i32
    %c0_i32_0 = arith.constant 0 : i32
    return %c0_i32, %arg0 : i32, i32
  }
}

</mosaic_0001>

<bundles_post_ra>
// kernel: tpu_custom_call.1
= control target key start
LH: loop header
LB: loop body
LE: loop exit
PB: predicated region body
PF: predicated region fallthrough
CT: control target
= control target key end

     0   :  { %9 = vsyncpa [#allocation4], 0  ;;  %s168_s0 = inlined_call_operand.hbm [shape: f32[16,128], index: 0, kind: input, shape index: {}]   ;;  %s169_s1 = inlined_call_operand.vmem [shape: f32[1,128], index: 1, kind: input, shape index: {}]   ;;  %s170_s2 = inlined_call_operand.<no memory space> [shape: f32[1], index: 2, kind: input, shape index: {}]   ;;  %s171_s3 = inlined_call_operand.hbm [shape: f32[1,16], index: 3, kind: output, shape index: {}]  }
   0x1   :  { %10 = vsyncpa [#allocation5], 0  ;;  %s15_s14 = sshll.u32 %s168_s0, 4  ;;  %s132_s15 = smov [#allocation3]   ;;  %s16_s14 = int_to_ptr.hbm [resolvable:$true] %s15_s14 }
   0x2   :  { %s17_s16 = sshll.u32 %s132_s15, 4  ;;  %s133_s17 = smov 128   ;;  %s18_s16 = int_to_ptr.vmem [resolvable:$true] %s17_s16 }
   0x3   :  { %s134_s18 = smov 8  }
   0x4   :  { %23 = dma.hbm_to_vmem [thread:$0]  %s16_s14, 256, %s18_s16, [#allocation4], %s133_s17, %s133_s17, %s134_s18  }
   0x5   :  { %128 = dma.done.wait [#allocation4], 256  }
   0x6   :  { %129 = vsyncadd [#allocation4], 4294967040  ;;  %v34_v0 = vld [vmem:[#allocation3 + $0x8] sm:$0xff]  ;;  %v33_v1 = vld [vmem:[#allocation3] sm:$0xff]  ;;  %v36_v3 = vstv %s170_s2  ;;  %s135_s22 = smov [#allocation6]   ;;  %s66_s26 = sshll.u32 %s171_s3, 4  ;;  %s67_s26 = int_to_ptr.hbm [resolvable:$true] %s66_s26 }
   0x7   :  { %51 = vmatpush.xpose.msra.mxu0 %v34_v0  ;;  %v32_v2 = vld [vmem:[%s169_s1] sm:$0x1]  ;;  %s64_s23 = sshll.u32 %s135_s22, 4  ;;  %vm57_vm0 = vcmask 122880   ;;  %s65_s23 = int_to_ptr.vmem [resolvable:$true] %s64_s23 }
   0xb   :  { %52 = vmatpush.xpose.msra.mxu0 %v33_v1 }
   0xe   :  { %53 = vmatmul.f32.vlgmr.msra.gmra.mxu0 %v32_v2 }
  0x8b   :  { %v54_v4 = vpop.f32.mrf.mxu0 }
  0x8c   :  { %v55_v5 = vadd.f32 %v54_v4, %v36_v3 }
  0x8e   :  { %58 = vst.msk [vmem:[#allocation6] sm:$0x1] %vm57_vm0, %v55_v5 }
  0x8f   :  { %69 = dma.vmem_to_hbm [thread:$0]  %s65_s23, 16, %s67_s26, [#allocation5]  }
  0x90   :  { %130 = dma.done.wait [#allocation5], 16  }
  0x91   :  { %131 = vsyncadd [#allocation5], 4294967280 }
  0x92   :  { %74 = vsyncpa [#allocation4], 1 }
  0x93   :  { %75 = vsyncpa [#allocation5], 1 }

</bundles_post_ra>
